<compile_context>
chip_gen: v7x
topology: tpu7x:2x2x1
jax: 0.10.0
libtpu: 0.0.40
codegen_flags: <defaults>
</compile_context>

<pallas_src>
import functools

import jax
import jax.numpy as jnp
from jax.experimental import pallas as pl
from jax.experimental.pallas import tpu as pltpu


def _round_up(x, m):
    return ((x + m - 1) // m) * m


def _ram_kernel(x_ref, wconv_ref, bconv_ref, wlin_ref, blin_ref,
                v_ref, d_ref, *, C, HW, M):
    # x_ref:     (TB, C*HW) VMEM — channel c occupies lanes [c*HW, (c+1)*HW)
    # wconv_ref: (C,)    SMEM — row 0 of the 1x1 conv weight
    # bconv_ref: (1,)    SMEM — conv bias for channel 0
    # wlin_ref:  (M*C,)  SMEM — Linear weight, flattened row-major
    # blin_ref:  (M,)    SMEM — Linear bias
    # v_ref:     (TB, C) pooled attention vectors
    # d_ref:     (TB, M) softmax(Linear(v))
    inv_hw = 1.0 / HW

    # 1x1 conv (channel-0 output only) + sigmoid: unrolled per-channel
    # scalar * (TB, HW)-slab MAC on the VPU, EUP sigmoid.  No sublane reduce.
    a = x_ref[:, 0:HW] * wconv_ref[0]
    for c in range(1, C):
        a = a + x_ref[:, c * HW:(c + 1) * HW] * wconv_ref[c]
    a0 = jax.nn.sigmoid(a + bconv_ref[0])                      # (TB, HW)

    # adaptive_avg_pool2d(a0 * x, 1): per-channel lane reduce over HW.
    v_cols = []
    for c in range(C):
        xc = x_ref[:, c * HW:(c + 1) * HW]                     # (TB, HW)
        v_cols.append(jnp.sum(xc * a0, axis=-1, keepdims=True) * inv_hw)
    v = jnp.concatenate(v_cols, axis=-1)                       # (TB, C)

    # Linear(C -> M) from SMEM scalars (C, M tiny) + stable softmax.
    logit_cols = []
    for m in range(M):
        lm = v_cols[0] * wlin_ref[m * C + 0]
        for c in range(1, C):
            lm = lm + v_cols[c] * wlin_ref[m * C + c]
        logit_cols.append(lm + blin_ref[m])
    logits = jnp.concatenate(logit_cols, axis=-1)              # (TB, M)
    mx = jnp.max(logits, axis=-1, keepdims=True)
    e = jnp.exp(logits - mx)
    d = e / jnp.sum(e, axis=-1, keepdims=True)

    v_ref[...] = v
    d_ref[...] = d


def _choose_batch_tile(B, C, HW, itemsize=4, target_bytes=6 << 20):
    """Pick the batch tile TB for the (TB, C*HW) x block.

    * Targets ~6 MiB of (lane-padded) x per grid step so HBM streaming runs
      near roofline while the double-buffered footprint stays inside every
      generation's scoped VMEM.
    * TB is a multiple of 8 (dense sublanes) unless it covers the full batch.
    * Keeps >= 2 grid steps (v7x's two TensorCores) only when each half of
      the problem is > ~1 MiB, i.e. when splitting beats per-step overhead.
    """
    lane_bytes = _round_up(C * HW, 128) * itemsize       # padded bytes per row
    tb = max(1, target_bytes // lane_bytes)
    half = -(-B // 2)
    if B >= 2 and half * lane_bytes >= (1 << 20):
        tb = min(tb, half)                               # v7x two-TC split
    tb = min(tb, B)
    if tb < B:
        # Partial-batch blocks: keep the sublane dim a multiple of 8.
        tb = 8 * max(1, tb // 8)
        if tb >= B:
            tb = B
    return int(tb)


def ram_forward(x_bchw, wconv, bconv, wlin, blin):
    """x_bchw: (B, C, H, W) f32; wconv: (M, C, 1, 1); bconv: (M,);
    wlin: (M, C); blin: (M,). Returns ([d]*4, [v]*4) like the PyTorch module."""
    B, C, H, W = x_bchw.shape
    HW = H * W
    M = wconv.shape[0]

    # Channel-contiguous lanes: (B, C*HW) is a free view of (B, C, H, W).
    x = x_bchw.reshape(B, C * HW).astype(jnp.float32)
    # Only conv-output channel 0 is ever consumed by the forward pass.
    wconv0 = wconv.reshape(M, C)[0].astype(jnp.float32)        # (C,)   -> SMEM
    bconv0 = bconv[0:1].astype(jnp.float32)                    # (1,)   -> SMEM
    wlin_f = jnp.asarray(wlin, jnp.float32).reshape(M * C)     # (M*C,) -> SMEM
    blin_f = jnp.asarray(blin, jnp.float32).reshape(M)         # (M,)   -> SMEM

    TB = _choose_batch_tile(B, C, HW)
    grid = (pl.cdiv(B, TB),)

    # Explicit VMEM budget: double-buffered x tile + elementwise temporaries
    # (a, a0, per-channel product) + outputs/scalars headroom.  Padded
    # accounting (sublanes to 8, lanes to 128) so v7x (32 MiB scoped /
    # 64 MiB physical) never overflows.
    lane_bytes = _round_up(C * HW, 128) * 4
    slab_bytes = _round_up(HW, 128) * 4
    tb_pad = _round_up(TB, 8)
    vmem_needed = 2 * tb_pad * lane_bytes + 4 * tb_pad * slab_bytes + (1 << 20)
    vmem_limit = int(min(max(vmem_needed, 16 << 20), 32 << 20))

    cost = pl.CostEstimate(
        flops=int(B * (4 * C * HW + 2 * C * M + 4 * M)),
        transcendentals=int(B * (HW + M)),
        bytes_accessed=int(4 * (B * C * HW + C + 1 + M * C + M
                                + B * C + B * M)),
    )

    kernel = functools.partial(_ram_kernel, C=C, HW=HW, M=M)

    v, d = pl.pallas_call(
        kernel,
        out_shape=(jax.ShapeDtypeStruct((B, C), jnp.float32),
                   jax.ShapeDtypeStruct((B, M), jnp.float32)),
        grid=grid,
        in_specs=[
            pl.BlockSpec((TB, C * HW), lambda b: (b, 0)),          # x tile
            pl.BlockSpec(memory_space=pltpu.MemorySpace.SMEM),     # conv w row0
            pl.BlockSpec(memory_space=pltpu.MemorySpace.SMEM),     # conv bias0
            pl.BlockSpec(memory_space=pltpu.MemorySpace.SMEM),     # linear w
            pl.BlockSpec(memory_space=pltpu.MemorySpace.SMEM),     # linear b
        ],
        out_specs=(pl.BlockSpec((TB, C), lambda b: (b, 0)),
                   pl.BlockSpec((TB, M), lambda b: (b, 0))),
        compiler_params=pltpu.CompilerParams(
            dimension_semantics=("parallel",),
            vmem_limit_bytes=vmem_limit),
        cost_estimate=cost,
    )(x, wconv0, bconv0, wlin_f, blin_f)

    # All four vectors use attn_map[:, 0] in the reference -> identical results.
    return ([d, d, d, d], [v, v, v, v])


def ram_reference(x, wconv, bconv, wlin, blin):
    """Pure-JAX reference mirroring the PyTorch module (channel 0 path)."""
    a0 = jax.nn.sigmoid(
        jnp.einsum("c,bchw->bhw", wconv[0, :, 0, 0], x) + bconv[0])  # (B,H,W)
    v = jnp.mean(a0[:, None, :, :] * x, axis=(2, 3))                 # (B,C)
    d = jax.nn.softmax(v @ wlin.T + blin[None, :], axis=-1)          # (B,M)
    return d, v


if __name__ == "__main__":
    B, C, H, W, M = 2, 4, 16, 16, 4   # output_channels=4, M=4

    key = jax.random.PRNGKey(0)
    kx, kw1, kb1, kw2, kb2 = jax.random.split(key, 5)

    x = jax.random.normal(kx, (B, C, H, W), dtype=jnp.float32)
    # Deterministic synthetic parameters (shapes from nn.Conv2d / nn.Linear).
    wconv = jax.random.normal(kw1, (M, C, 1, 1), dtype=jnp.float32) * 0.5
    bconv = jax.random.normal(kb1, (M,), dtype=jnp.float32) * 0.1
    wlin = jax.random.normal(kw2, (M, C), dtype=jnp.float32) * 0.5
    blin = jax.random.normal(kb2, (M,), dtype=jnp.float32) * 0.1

    (d_list, v_list) = ram_forward(x, wconv, bconv, wlin, blin)
    jax.block_until_ready((d_list, v_list))

    d_ref, v_ref = ram_reference(x, wconv, bconv, wlin, blin)
    assert all(jnp.allclose(d, d_ref, atol=1e-5) for d in d_list)
    assert all(jnp.allclose(v, v_ref, atol=1e-5) for v in v_list)

    print("KERNEL_OK")
</pallas_src>

<mosaic_0001>
module attributes {stable_mosaic.version = 11 : i64} {
  func.func @_ram_kernel(%arg0: i32, %arg1: memref<2x1024xf32, #tpu.memory_space<vmem>>, %arg2: memref<4xf32, #tpu.memory_space<smem>>, %arg3: memref<1xf32, #tpu.memory_space<smem>>, %arg4: memref<16xf32, #tpu.memory_space<smem>>, %arg5: memref<4xf32, #tpu.memory_space<smem>>, %arg6: memref<2x4xf32, #tpu.memory_space<vmem>>, %arg7: memref<2x4xf32, #tpu.memory_space<vmem>>) attributes {dimension_semantics = [#tpu.dimension_semantics<parallel>], iteration_bounds = array<i64: 1>, scalar_prefetch = 0 : i64, scratch_operands = 0 : i64, tpu.core_type = #tpu.core_type<tc>, window_params = [{transform_indices = @transform_0, window_bounds = array<i64: 2, 1024>}, {transform_indices = @transform_1, window_bounds = array<i64: 4>}, {transform_indices = @transform_2, window_bounds = array<i64: 1>}, {transform_indices = @transform_3, window_bounds = array<i64: 16>}, {transform_indices = @transform_4, window_bounds = array<i64: 4>}, {transform_indices = @transform_5, window_bounds = array<i64: 2, 4>}, {transform_indices = @transform_6, window_bounds = array<i64: 2, 4>}]} {
    %c0 = arith.constant 0 : index
    %c0_0 = arith.constant 0 : index
    %0 = vector.load %arg1[%c0, %c0_0] : memref<2x1024xf32, #tpu.memory_space<vmem>>, vector<2x256xf32>
    %c0_1 = arith.constant 0 : index
    %1 = memref.load %arg2[%c0_1] : memref<4xf32, #tpu.memory_space<smem>>
    %2 = vector.broadcast %1 : f32 to vector<2x256xf32>
    %3 = arith.mulf %0, %2 : vector<2x256xf32>
    %c0_2 = arith.constant 0 : index
    %c256 = arith.constant 256 : index
    %4 = vector.load %arg1[%c0_2, %c256] : memref<2x1024xf32, #tpu.memory_space<vmem>>, vector<2x256xf32>
    %c1 = arith.constant 1 : index
    %5 = memref.load %arg2[%c1] : memref<4xf32, #tpu.memory_space<smem>>
    %6 = vector.broadcast %5 : f32 to vector<2x256xf32>
    %7 = arith.mulf %4, %6 : vector<2x256xf32>
    %8 = arith.addf %3, %7 : vector<2x256xf32>
    %c0_3 = arith.constant 0 : index
    %c512 = arith.constant 512 : index
    %9 = vector.load %arg1[%c0_3, %c512] : memref<2x1024xf32, #tpu.memory_space<vmem>>, vector<2x256xf32>
    %c2 = arith.constant 2 : index
    %10 = memref.load %arg2[%c2] : memref<4xf32, #tpu.memory_space<smem>>
    %11 = vector.broadcast %10 : f32 to vector<2x256xf32>
    %12 = arith.mulf %9, %11 : vector<2x256xf32>
    %13 = arith.addf %8, %12 : vector<2x256xf32>
    %c0_4 = arith.constant 0 : index
    %c768 = arith.constant 768 : index
    %14 = vector.load %arg1[%c0_4, %c768] : memref<2x1024xf32, #tpu.memory_space<vmem>>, vector<2x256xf32>
    %c3 = arith.constant 3 : index
    %15 = memref.load %arg2[%c3] : memref<4xf32, #tpu.memory_space<smem>>
    %16 = vector.broadcast %15 : f32 to vector<2x256xf32>
    %17 = arith.mulf %14, %16 : vector<2x256xf32>
    %18 = arith.addf %13, %17 : vector<2x256xf32>
    %c0_5 = arith.constant 0 : index
    %19 = memref.load %arg3[%c0_5] : memref<1xf32, #tpu.memory_space<smem>>
    %20 = vector.broadcast %19 : f32 to vector<2x256xf32>
    %21 = arith.addf %18, %20 : vector<2x256xf32>
    %22 = arith.negf %21 : vector<2x256xf32>
    %23 = math.exp %22 : vector<2x256xf32>
    %cst = arith.constant 1.000000e+00 : f32
    %24 = vector.broadcast %cst : f32 to vector<2x256xf32>
    %25 = arith.addf %24, %23 : vector<2x256xf32>
    %26 = arith.divf %24, %25 : vector<2x256xf32>
    %c0_6 = arith.constant 0 : index
    %c0_7 = arith.constant 0 : index
    %27 = vector.load %arg1[%c0_6, %c0_7] : memref<2x1024xf32, #tpu.memory_space<vmem>>, vector<2x256xf32>
    %28 = arith.mulf %27, %26 : vector<2x256xf32>
    %cst_8 = arith.constant dense<0.000000e+00> : vector<2xf32>
    %29 = vector.multi_reduction <add>, %28, %cst_8 [1] : vector<2x256xf32> to vector<2xf32>
    %30 = vector.shape_cast %29 : vector<2xf32> to vector<2x1xf32>
    %cst_9 = arith.constant 3.906250e-03 : f32
    %31 = vector.broadcast %cst_9 : f32 to vector<2x1xf32>
    %32 = arith.mulf %30, %31 : vector<2x1xf32>
    %c0_10 = arith.constant 0 : index
    %c256_11 = arith.constant 256 : index
    %33 = vector.load %arg1[%c0_10, %c256_11] : memref<2x1024xf32, #tpu.memory_space<vmem>>, vector<2x256xf32>
    %34 = arith.mulf %33, %26 : vector<2x256xf32>
    %cst_12 = arith.constant dense<0.000000e+00> : vector<2xf32>
    %35 = vector.multi_reduction <add>, %34, %cst_12 [1] : vector<2x256xf32> to vector<2xf32>
    %36 = vector.shape_cast %35 : vector<2xf32> to vector<2x1xf32>
    %cst_13 = arith.constant 3.906250e-03 : f32
    %37 = vector.broadcast %cst_13 : f32 to vector<2x1xf32>
    %38 = arith.mulf %36, %37 : vector<2x1xf32>
    %c0_14 = arith.constant 0 : index
    %c512_15 = arith.constant 512 : index
    %39 = vector.load %arg1[%c0_14, %c512_15] : memref<2x1024xf32, #tpu.memory_space<vmem>>, vector<2x256xf32>
    %40 = arith.mulf %39, %26 : vector<2x256xf32>
    %cst_16 = arith.constant dense<0.000000e+00> : vector<2xf32>
    %41 = vector.multi_reduction <add>, %40, %cst_16 [1] : vector<2x256xf32> to vector<2xf32>
    %42 = vector.shape_cast %41 : vector<2xf32> to vector<2x1xf32>
    %cst_17 = arith.constant 3.906250e-03 : f32
    %43 = vector.broadcast %cst_17 : f32 to vector<2x1xf32>
    %44 = arith.mulf %42, %43 : vector<2x1xf32>
    %c0_18 = arith.constant 0 : index
    %c768_19 = arith.constant 768 : index
    %45 = vector.load %arg1[%c0_18, %c768_19] : memref<2x1024xf32, #tpu.memory_space<vmem>>, vector<2x256xf32>
    %46 = arith.mulf %45, %26 : vector<2x256xf32>
    %cst_20 = arith.constant dense<0.000000e+00> : vector<2xf32>
    %47 = vector.multi_reduction <add>, %46, %cst_20 [1] : vector<2x256xf32> to vector<2xf32>
    %48 = vector.shape_cast %47 : vector<2xf32> to vector<2x1xf32>
    %cst_21 = arith.constant 3.906250e-03 : f32
    %49 = vector.broadcast %cst_21 : f32 to vector<2x1xf32>
    %50 = arith.mulf %48, %49 : vector<2x1xf32>
    %51 = tpu.concatenate %32, %38, %44, %50 in 1 : vector<2x1xf32>, vector<2x1xf32>, vector<2x1xf32>, vector<2x1xf32> -> vector<2x4xf32>
    %c0_22 = arith.constant 0 : index
    %52 = memref.load %arg4[%c0_22] : memref<16xf32, #tpu.memory_space<smem>>
    %53 = vector.broadcast %52 : f32 to vector<2x1xf32>
    %54 = arith.mulf %32, %53 : vector<2x1xf32>
    %c1_23 = arith.constant 1 : index
    %55 = memref.load %arg4[%c1_23] : memref<16xf32, #tpu.memory_space<smem>>
    %56 = vector.broadcast %55 : f32 to vector<2x1xf32>
    %57 = arith.mulf %38, %56 : vector<2x1xf32>
    %58 = arith.addf %54, %57 : vector<2x1xf32>
    %c2_24 = arith.constant 2 : index
    %59 = memref.load %arg4[%c2_24] : memref<16xf32, #tpu.memory_space<smem>>
    %60 = vector.broadcast %59 : f32 to vector<2x1xf32>
    %61 = arith.mulf %44, %60 : vector<2x1xf32>
    %62 = arith.addf %58, %61 : vector<2x1xf32>
    %c3_25 = arith.constant 3 : index
    %63 = memref.load %arg4[%c3_25] : memref<16xf32, #tpu.memory_space<smem>>
    %64 = vector.broadcast %63 : f32 to vector<2x1xf32>
    %65 = arith.mulf %50, %64 : vector<2x1xf32>
    %66 = arith.addf %62, %65 : vector<2x1xf32>
    %c0_26 = arith.constant 0 : index
    %67 = memref.load %arg5[%c0_26] : memref<4xf32, #tpu.memory_space<smem>>
    %68 = vector.broadcast %67 : f32 to vector<2x1xf32>
    %69 = arith.addf %66, %68 : vector<2x1xf32>
    %c4 = arith.constant 4 : index
    %70 = memref.load %arg4[%c4] : memref<16xf32, #tpu.memory_space<smem>>
    %71 = vector.broadcast %70 : f32 to vector<2x1xf32>
    %72 = arith.mulf %32, %71 : vector<2x1xf32>
    %c5 = arith.constant 5 : index
    %73 = memref.load %arg4[%c5] : memref<16xf32, #tpu.memory_space<smem>>
    %74 = vector.broadcast %73 : f32 to vector<2x1xf32>
    %75 = arith.mulf %38, %74 : vector<2x1xf32>
    %76 = arith.addf %72, %75 : vector<2x1xf32>
    %c6 = arith.constant 6 : index
    %77 = memref.load %arg4[%c6] : memref<16xf32, #tpu.memory_space<smem>>
    %78 = vector.broadcast %77 : f32 to vector<2x1xf32>
    %79 = arith.mulf %44, %78 : vector<2x1xf32>
    %80 = arith.addf %76, %79 : vector<2x1xf32>
    %c7 = arith.constant 7 : index
    %81 = memref.load %arg4[%c7] : memref<16xf32, #tpu.memory_space<smem>>
    %82 = vector.broadcast %81 : f32 to vector<2x1xf32>
    %83 = arith.mulf %50, %82 : vector<2x1xf32>
    %84 = arith.addf %80, %83 : vector<2x1xf32>
    %c1_27 = arith.constant 1 : index
    %85 = memref.load %arg5[%c1_27] : memref<4xf32, #tpu.memory_space<smem>>
    %86 = vector.broadcast %85 : f32 to vector<2x1xf32>
    %87 = arith.addf %84, %86 : vector<2x1xf32>
    %c8 = arith.constant 8 : index
    %88 = memref.load %arg4[%c8] : memref<16xf32, #tpu.memory_space<smem>>
    %89 = vector.broadcast %88 : f32 to vector<2x1xf32>
    %90 = arith.mulf %32, %89 : vector<2x1xf32>
    %c9 = arith.constant 9 : index
    %91 = memref.load %arg4[%c9] : memref<16xf32, #tpu.memory_space<smem>>
    %92 = vector.broadcast %91 : f32 to vector<2x1xf32>
    %93 = arith.mulf %38, %92 : vector<2x1xf32>
    %94 = arith.addf %90, %93 : vector<2x1xf32>
    %c10 = arith.constant 10 : index
    %95 = memref.load %arg4[%c10] : memref<16xf32, #tpu.memory_space<smem>>
    %96 = vector.broadcast %95 : f32 to vector<2x1xf32>
    %97 = arith.mulf %44, %96 : vector<2x1xf32>
    %98 = arith.addf %94, %97 : vector<2x1xf32>
    %c11 = arith.constant 11 : index
    %99 = memref.load %arg4[%c11] : memref<16xf32, #tpu.memory_space<smem>>
    %100 = vector.broadcast %99 : f32 to vector<2x1xf32>
    %101 = arith.mulf %50, %100 : vector<2x1xf32>
    %102 = arith.addf %98, %101 : vector<2x1xf32>
    %c2_28 = arith.constant 2 : index
    %103 = memref.load %arg5[%c2_28] : memref<4xf32, #tpu.memory_space<smem>>
    %104 = vector.broadcast %103 : f32 to vector<2x1xf32>
    %105 = arith.addf %102, %104 : vector<2x1xf32>
    %c12 = arith.constant 12 : index
    %106 = memref.load %arg4[%c12] : memref<16xf32, #tpu.memory_space<smem>>
    %107 = vector.broadcast %106 : f32 to vector<2x1xf32>
    %108 = arith.mulf %32, %107 : vector<2x1xf32>
    %c13 = arith.constant 13 : index
    %109 = memref.load %arg4[%c13] : memref<16xf32, #tpu.memory_space<smem>>
    %110 = vector.broadcast %109 : f32 to vector<2x1xf32>
    %111 = arith.mulf %38, %110 : vector<2x1xf32>
    %112 = arith.addf %108, %111 : vector<2x1xf32>
    %c14 = arith.constant 14 : index
    %113 = memref.load %arg4[%c14] : memref<16xf32, #tpu.memory_space<smem>>
    %114 = vector.broadcast %113 : f32 to vector<2x1xf32>
    %115 = arith.mulf %44, %114 : vector<2x1xf32>
    %116 = arith.addf %112, %115 : vector<2x1xf32>
    %c15 = arith.constant 15 : index
    %117 = memref.load %arg4[%c15] : memref<16xf32, #tpu.memory_space<smem>>
    %118 = vector.broadcast %117 : f32 to vector<2x1xf32>
    %119 = arith.mulf %50, %118 : vector<2x1xf32>
    %120 = arith.addf %116, %119 : vector<2x1xf32>
    %c3_29 = arith.constant 3 : index
    %121 = memref.load %arg5[%c3_29] : memref<4xf32, #tpu.memory_space<smem>>
    %122 = vector.broadcast %121 : f32 to vector<2x1xf32>
    %123 = arith.addf %120, %122 : vector<2x1xf32>
    %124 = tpu.concatenate %69, %87, %105, %123 in 1 : vector<2x1xf32>, vector<2x1xf32>, vector<2x1xf32>, vector<2x1xf32> -> vector<2x4xf32>
    %cst_30 = arith.constant dense<0xFF800000> : vector<2xf32>
    %125 = vector.multi_reduction <maximumf>, %124, %cst_30 [1] : vector<2x4xf32> to vector<2xf32>
    %126 = vector.shape_cast %125 : vector<2xf32> to vector<2x1xf32>
    %127 = vector.broadcast %126 : vector<2x1xf32> to vector<2x4xf32>
    %128 = arith.subf %124, %127 : vector<2x4xf32>
    %129 = math.exp %128 : vector<2x4xf32>
    %cst_31 = arith.constant dense<0.000000e+00> : vector<2xf32>
    %130 = vector.multi_reduction <add>, %129, %cst_31 [1] : vector<2x4xf32> to vector<2xf32>
    %131 = vector.shape_cast %130 : vector<2xf32> to vector<2x1xf32>
    %132 = vector.broadcast %131 : vector<2x1xf32> to vector<2x4xf32>
    %133 = arith.divf %129, %132 : vector<2x4xf32>
    %c0_32 = arith.constant 0 : index
    %c0_33 = arith.constant 0 : index
    %134 = vector.load %arg6[%c0_32, %c0_33] : memref<2x4xf32, #tpu.memory_space<vmem>>, vector<2x4xf32>
    tpu.vector_store %arg6[%c0_32, %c0_33], %51 {strides = array<i32>} : memref<2x4xf32, #tpu.memory_space<vmem>>, vector<2x4xf32>,
    %c0_34 = arith.constant 0 : index
    %c0_35 = arith.constant 0 : index
    %135 = vector.load %arg7[%c0_34, %c0_35] : memref<2x4xf32, #tpu.memory_space<vmem>>, vector<2x4xf32>
    tpu.vector_store %arg7[%c0_34, %c0_35], %133 {strides = array<i32>} : memref<2x4xf32, #tpu.memory_space<vmem>>, vector<2x4xf32>,
    return
  }
  func.func @transform_0(%arg0: i32) -> (i32, i32) {
    %c0_i32 = arith.constant 0 : i32
    %c0_i32_0 = arith.constant 0 : i32
    return %arg0, %c0_i32 : i32, i32
  }
  func.func @transform_1(%arg0: i32) -> i32 {
    %c0_i32 = arith.constant 0 : i32
    %c0_i32_0 = arith.constant 0 : i32
    return %c0_i32 : i32
  }
  func.func @transform_2(%arg0: i32) -> i32 {
    %c0_i32 = arith.constant 0 : i32
    %c0_i32_0 = arith.constant 0 : i32
    return %c0_i32 : i32
  }
  func.func @transform_3(%arg0: i32) -> i32 {
    %c0_i32 = arith.constant 0 : i32
    %c0_i32_0 = arith.constant 0 : i32
    return %c0_i32 : i32
  }
  func.func @transform_4(%arg0: i32) -> i32 {
    %c0_i32 = arith.constant 0 : i32
    %c0_i32_0 = arith.constant 0 : i32
    return %c0_i32 : i32
  }
  func.func @transform_5(%arg0: i32) -> (i32, i32) {
    %c0_i32 = arith.constant 0 : i32
    %c0_i32_0 = arith.constant 0 : i32
    return %arg0, %c0_i32 : i32, i32
  }
  func.func @transform_6(%arg0: i32) -> (i32, i32) {
    %c0_i32 = arith.constant 0 : i32
    %c0_i32_0 = arith.constant 0 : i32
    return %arg0, %c0_i32 : i32, i32
  }
}

</mosaic_0001>

<bundles_post_ra>
// kernel: tpu_custom_call.1
= control target key start
LH: loop header
LB: loop body
LE: loop exit
PB: predicated region body
PF: predicated region fallthrough
CT: control target
= control target key end

     0   :  { %13 = vsyncpa [#allocation4], 0  ;;  %s617_s0 = inlined_call_operand.hbm [shape: f32[2,1024], index: 0, kind: input, shape index: {}]   ;;  %s618_s1 = inlined_call_operand.vmem [shape: f32[4], index: 1, kind: input, shape index: {}]   ;;  %s619_s2 = inlined_call_operand.<no memory space> [shape: f32[1], index: 2, kind: input, shape index: {}]   ;;  %s620_s3 = inlined_call_operand.vmem [shape: f32[16], index: 3, kind: input, shape index: {}]   ;;  %s621_s4 = inlined_call_operand.vmem [shape: f32[4], index: 4, kind: input, shape index: {}]   ;;  %s622_s5 = inlined_call_operand.hbm [shape: f32[2,4], index: 5, kind: output, shape index: {0}]   ;;  %s623_s6 = inlined_call_operand.hbm [shape: f32[2,4], index: 6, kind: output, shape index: {1}]  }
   0x1   :  { %14 = vsyncpa [#allocation6], 0 }
   0x2   :  { %15 = vsyncpa [#allocation9], 0 }
   0x3   :  { %16 = vsyncpa [#allocation5], 0  ;;  %s46_s23 = sshll.u32 %s620_s3, 4  ;;  %s47_s23 = int_to_ptr.vmem [resolvable:$true] %s46_s23 }
   0x4   :  { %17 = vsyncpa [#allocation13], 0  ;;  %s337_s24 = scalar_lea.vmem %s47_s23, 16  ;;  %p342_p1 = scmp.lt.s32.totalorder %s47_s23, %s47_s23 }
   0x5   :  { %p338_p0 = scmp.ne.s32.totalorder %s47_s23, %s337_s24  ;;  %p343_p2 = scmp.lt.s32.totalorder %s337_s24, %s337_s24 }
   0x7   :  { %p344_p3 = por %p343_p2, %p342_p1 }
   0x9   :  { %p345_p4 = pnand %p344_p3, %p338_p0 }
   0xb   :  { %348 = shalt.err (!%p345_p4)
}
   0xc   :  { %s449_s25 = smov [#allocation8]   ;;  %s450_s26 = smov [#allocation3]  }
   0xd   :  { %49 = dma.vmem_to_smem %s47_s23, 16, %s449_s25, [#allocation9]  }
   0xe   :  { %s24_s27 = sshll.u32 %s450_s26, 4  ;;  %s34_s30 = sshll.u32 %s618_s1, 4  ;;  %s25_s27 = int_to_ptr.vmem [resolvable:$true] %s24_s27  ;;  %s35_s30 = int_to_ptr.vmem [resolvable:$true] %s34_s30 }
   0xf   :  { %s349_s8 = scalar_lea.hbm %s617_s0, 256 }
  0x10   :  { %p350_p5 = scmp.ne.s32.totalorder %s617_s0, %s349_s8  ;;  %p353_p6 = scmp.lt.u32.totalorder %s349_s8, %s617_s0 }
  0x12   :  { %p355_p7 = pnand %p353_p6, %p350_p5 }
  0x14   :  { %358 = shalt.err (!%p355_p7)
}
  0x15   :  { %s359_s13 = scalar_lea.vmem %s25_s27, 256  ;;  %p364_p9 = scmp.lt.s32.totalorder %s25_s27, %s25_s27 }
  0x16   :  { %p360_p8 = scmp.ne.s32.totalorder %s25_s27, %s359_s13  ;;  %p365_p10 = scmp.lt.s32.totalorder %s359_s13, %s359_s13 }
  0x18   :  { %p366_p11 = por %p365_p10, %p364_p9 }
  0x1a   :  { %p367_p12 = pnand %p366_p11, %p360_p8 }
  0x1c   :  { %370 = shalt.err (!%p367_p12)
}
  0x1d   :  { %27 = dma.hbm_to_vmem [thread:$0]  %s617_s0, 256, %s25_s27, [#allocation4]  }
  0x1e   :  { %s56_s17 = sshll.u32 %s621_s4, 4  ;;  %s371_s18 = scalar_lea.vmem %s35_s30, 16  ;;  %s57_s17 = int_to_ptr.vmem [resolvable:$true] %s56_s17 }
  0x1f   :  { %p372_p13 = scmp.ne.s32.totalorder %s35_s30, %s371_s18  ;;  %p376_p0 = scmp.lt.s32.totalorder %s35_s30, %s35_s30 }
  0x20   :  { %p377_p1 = scmp.lt.s32.totalorder %s371_s18, %s371_s18 }
  0x22   :  { %p378_p2 = por %p377_p1, %p376_p0 }
  0x24   :  { %p379_p3 = pnand %p378_p2, %p372_p13 }
  0x26   :  { %382 = shalt.err (!%p379_p3)
}
  0x27   :  { %s451_s19 = smov [#allocation7]   ;;  %s383_s20 = scalar_lea.vmem %s57_s17, 16 }
  0x28   :  { %37 = dma.vmem_to_smem %s35_s30, 16, %s451_s19, [#allocation6]  }
  0x29   :  { %p384_p4 = scmp.ne.s32.totalorder %s57_s17, %s383_s20  ;;  %p388_p5 = scmp.lt.s32.totalorder %s57_s17, %s57_s17 }
  0x2a   :  { %p389_p6 = scmp.lt.s32.totalorder %s383_s20, %s383_s20 }
  0x2c   :  { %p390_p7 = por %p389_p6, %p388_p5 }
  0x2e   :  { %p391_p8 = pnand %p390_p7, %p384_p4 }
  0x30   :  { %394 = shalt.err (!%p391_p8)
}
  0x31   :  { %s452_s0 = smov [#allocation10]  }
  0x32   :  { %59 = dma.vmem_to_smem %s57_s17, 16, %s452_s0, [#allocation9]  }
  0x33   :  { %439 = dma.done.wait [#allocation4], 256  }
  0x34   :  { %440 = vsyncadd [#allocation4], 4294967040 }
  0x35   :  { %441 = dma.done.wait [#allocation6], 16  }
  0x36   :  { %442 = vsyncadd [#allocation6], 4294967280 }
  0x37   :  { %443 = dma.done.wait [#allocation9], 32  }
  0x38   :  { %444 = vsyncadd [#allocation9], 4294967264 }
  0x39   :  { %72 = sfence }
  0x3a   :  { %s74_s4 = sld [smem:[#allocation7]]  ;;  %s300_s21 = sld [smem:[#allocation7 + $0x1]]  ;;  %v73_v0 = vld [vmem:[#allocation3] sm:$0xf]  ;;  %v77_v1 = vld [vmem:[#allocation3 + $0x4] sm:$0xf]  ;;  %v93_v14 = vstv %s619_s2  ;;  %v106_v22 = vlaneseq }
  0x3b   :  { %s301_s22 = sld [smem:[#allocation7 + $0x2]]  ;;  %s302_s23 = sld [smem:[#allocation7 + $0x3]]  ;;  %v82_v2 = vld [vmem:[#allocation3 + $0x8] sm:$0xf]  ;;  %v87_v7 = vld [vmem:[#allocation3 + $0xc] sm:$0xf] }
  0x3c   :  { %v453_v20 = vmov 1983009808   ;;  %v107_v24 = vshrl.u32 %v106_v22, 7  ;;  %vm113_vm0 = vcmask 1041408   ;;  %s523_s2 = sld [smem:[#allocation8]]  ;;  %s525_s26 = sld [smem:[#allocation8 + $0x4]] }
  0x3d   :  { %v104_v21 = vunpack.c.l.s4 %v453_v20  ;;  %s527_s27 = sld [smem:[#allocation8 + $0x8]]  ;;  %s529_s28 = sld [smem:[#allocation8 + $0xc]]  ;;  %vm174_vm1 = vcmask 7168   ;;  %vm176_vm2 = vcmask 15360   ;;  %vm178_vm3 = vcmask 23552  }
  0x3e   :  { %s531_s29 = sld [smem:[#allocation8 + $0x2]]  ;;  %s533_s30 = sld [smem:[#allocation8 + $0x6]]  ;;  %vm255_vm4 = vcmask 25600  }
  0x3f   :  { %v105_v23 = vunpack.c.0.s8 %v104_v21  ;;  %s535_s3 = sld [smem:[#allocation8 + $0xa]]  ;;  %s537_s7 = sld [smem:[#allocation8 + $0x1]] }
  0x40   :  { %v75_v3 = vstv %s74_s4  ;;  %v79_v5 = vstv %s300_s21  ;;  %s539_s8 = sld [smem:[#allocation8 + $0x5]]  ;;  %s541_s9 = sld [smem:[#allocation8 + $0x9]] }
  0x41   :  { %v76_v4 = vmul.f32 %v75_v3, %v73_v0  ;;  %v84_v6 = vstv %s301_s22  ;;  %v80_v8 = vmul.f32 %v79_v5, %v77_v1  ;;  %v89_v10 = vstv %s302_s23  ;;  %s543_s10 = sld [smem:[#allocation8 + $0xd]]  ;;  %s545_s11 = sld [smem:[#allocation8 + $0xe]] }
  0x42   :  { %v85_v9 = vmul.f32 %v84_v6, %v82_v2  ;;  %v90_v12 = vmul.f32 %v89_v10, %v87_v7  ;;  %v108_v25 = vsub.s32 %v105_v23, %v107_v24  ;;  %s547_s12 = sld [smem:[#allocation8 + $0x3]]  ;;  %s549_s13 = sld [smem:[#allocation8 + $0x7]]  ;;  %v181_v51 = vstv %s523_s2 }
  0x43   :  { %v81_v11 = vadd.f32 %v80_v8, %v76_v4  ;;  %s551_s1 = sld [smem:[#allocation8 + $0xb]]  ;;  %s553_s14 = sld [smem:[#allocation8 + $0xf]]  ;;  %v199_v52 = vstv %s525_s26  ;;  %v217_v53 = vstv %s527_s27  ;;  %v235_v54 = vstv %s529_s28 }
  0x44   :  { %v188_v56 = vstv %s531_s29  ;;  %v206_v57 = vstv %s533_s30  ;;  %s568_s15 = sld [smem:[#allocation10]]  ;;  %s571_s16 = sld [smem:[#allocation10 + $0x1]] }
  0x45   :  { %v86_v13 = vadd.f32 %v85_v9, %v81_v11  ;;  %v224_v60 = vstv %s535_s3  ;;  %v184_v62 = vstv %s537_s7  ;;  %s574_s17 = sld [smem:[#allocation10 + $0x2]]  ;;  %s577_s18 = sld [smem:[#allocation10 + $0x3]] }
  0x46   :  { %v202_v63 = vstv %s539_s8  ;;  %s454_s19 = smov [#allocation11]  }
  0x47   :  { %v91_v15 = vadd.f32 %v90_v12, %v86_v13  ;;  %v242_v4 = vstv %s545_s11  ;;  %s275_s20 = sshll.u32 %s454_s19, 4  ;;  %s276_s20 = int_to_ptr.vmem [resolvable:$true] %s275_s20 }
  0x48   :  { %v210_v3 = vstv %s549_s13  ;;  %s395_s0 = scalar_lea.vmem %s276_s20, 32  ;;  %p400_p10 = scmp.lt.s32.totalorder %s276_s20, %s276_s20 }
  0x49   :  { %v94_v16 = vadd.f32 %v93_v14, %v91_v15  ;;  %v228_v9 = vstv %s551_s1  ;;  %v246_v10 = vstv %s553_s14  ;;  %p396_p9 = scmp.ne.s32.totalorder %s276_s20, %s395_s0  ;;  %p401_p11 = scmp.lt.s32.totalorder %s395_s0, %s395_s0 }
  0x4b   :  { %v303_v17 = vmul.f32 -1.442695, %v94_v16  ;;  %p402_p12 = por %p401_p11, %p400_p10 }
  0x4d   :  { %329 = vpow2.f32 %v303_v17  ;;  %p403_p13 = pnand %p402_p12, %p396_p9 }
  0x57   :  { %v330_v18 = vpop.eup %329 }
  0x58   :  { %v98_v19 = vadd.f32 1.0, %v330_v18 }
  0x5a   :  { %331 = vrcp.f32 %v98_v19 }
  0x64   :  { %v332_v26 = vpop.eup %331 }
  0x65   :  { %v101_v27 = vmul.f32 %v332_v26, %v73_v0  ;;  %v138_v28 = vmul.f32 %v332_v26, %v82_v2  ;;  %v120_v29 = vmul.f32 %v332_v26, %v77_v1  ;;  %v156_v30 = vmul.f32 %v332_v26, %v87_v7 }
  0x66   :  { %v220_v0 = vstv %s541_s9  ;;  %v238_v1 = vstv %s543_s10  ;;  %v192_v2 = vstv %s547_s12 }
  0x67   :  { %v109_v31 = vrot.slane %v101_v27, %v108_v25  ;;  %v146_v32 = vrot.slane %v138_v28, %v108_v25  ;;  %v128_v33 = vrot.slane %v120_v29, %v108_v25  ;;  %v164_v34 = vrot.slane %v156_v30, %v108_v25 }
  0x69   :  { %v110_v35 = vcombine.high %v109_v31, %v109_v31  ;;  %v114_v36 = vsel %vm113_vm0, %v109_v31, 0.0  ;;  %v147_v37 = vcombine.high %v146_v32, %v146_v32  ;;  %v150_v38 = vsel %vm113_vm0, %v146_v32, 0.0 }
  0x6a   :  { %v129_v39 = vcombine.high %v128_v33, %v128_v33  ;;  %v165_v40 = vcombine.high %v164_v34, %v164_v34  ;;  %v132_v43 = vsel %vm113_vm0, %v128_v33, 0.0  ;;  %v168_v44 = vsel %vm113_vm0, %v164_v34, 0.0 }
  0x6b   :  { %v115_v41 = vsel %vm113_vm0, %v110_v35, 0.0  ;;  %v151_v42 = vsel %vm113_vm0, %v147_v37, 0.0  ;;  %v214_v37 = vstv %s571_s16 }
  0x6c   :  { %v116_v45 = vadd.f32 %v115_v41, %v114_v36  ;;  %v152_v46 = vadd.f32 %v151_v42, %v150_v38  ;;  %v133_v47 = vsel %vm113_vm0, %v129_v39, 0.0  ;;  %v169_v48 = vsel %vm113_vm0, %v165_v40, 0.0 }
  0x6d   :  { %v134_v49 = vadd.f32 %v133_v47, %v132_v43  ;;  %v170_v50 = vadd.f32 %v169_v48, %v168_v44  ;;  %v196_v36 = vstv %s568_s15  ;;  %v232_v38 = vstv %s574_s17 }
  0x6e   :  { %117 = vadd.xlane.f32.xlu0 %v116_v45  ;;  %153 = vadd.xlane.f32.xlu1 %v152_v46  ;;  %v250_v44 = vstv %s577_s18 }
  0x72   :  { %135 = vadd.xlane.f32.xlu0 %v134_v49  ;;  %171 = vadd.xlane.f32.xlu1 %v170_v50 }
  0xfb   :  { %v118_v55 = vpop.xlane.xlu0 %117  ;;  %v154_v58 = vpop.xlane.xlu1 %153 }
  0xfc   :  { %v119_v59 = vmul.f32 0.00390625, %v118_v55  ;;  %v155_v61 = vmul.f32 0.00390625, %v154_v58 }
  0xfe   :  { %v182_v5 = vmul.f32 %v181_v51, %v119_v59  ;;  %v200_v6 = vmul.f32 %v199_v52, %v119_v59  ;;  %v218_v11 = vmul.f32 %v217_v53, %v119_v59  ;;  %v236_v12 = vmul.f32 %v235_v54, %v119_v59 }
  0xff   :  { %v136_v7 = vpop.xlane.xlu0 %135  ;;  %v172_v8 = vpop.xlane.xlu1 %171  ;;  %v189_v13 = vmul.f32 %v188_v56, %v155_v61  ;;  %v207_v15 = vmul.f32 %v206_v57, %v155_v61  ;;  %v225_v16 = vmul.f32 %v224_v60, %v155_v61  ;;  %v243_v18 = vmul.f32 %v242_v4, %v155_v61 }
 0x100   :  { %v137_v14 = vmul.f32 0.00390625, %v136_v7  ;;  %v173_v17 = vmul.f32 0.00390625, %v172_v8 }
 0x102   :  { %v185_v19 = vmul.f32 %v184_v62, %v137_v14  ;;  %v203_v20 = vmul.f32 %v202_v63, %v137_v14  ;;  %v221_v21 = vmul.f32 %v220_v0, %v137_v14  ;;  %v239_v22 = vmul.f32 %v238_v1, %v137_v14 }
 0x103   :  { %v193_v23 = vmul.f32 %v192_v2, %v173_v17  ;;  %v211_v24 = vmul.f32 %v210_v3, %v173_v17  ;;  %v229_v25 = vmul.f32 %v228_v9, %v173_v17  ;;  %v247_v26 = vmul.f32 %v246_v10, %v173_v17 }
 0x104   :  { %v186_v27 = vadd.f32 %v185_v19, %v182_v5  ;;  %v204_v28 = vadd.f32 %v203_v20, %v200_v6  ;;  %v222_v29 = vadd.f32 %v221_v21, %v218_v11  ;;  %v240_v30 = vadd.f32 %v239_v22, %v236_v12 }
 0x105   :  { %v175_v31 = vsel %vm174_vm1, %v119_v59, %v137_v14 }
 0x106   :  { %v190_v32 = vadd.f32 %v189_v13, %v186_v27  ;;  %v208_v33 = vadd.f32 %v207_v15, %v204_v28  ;;  %v226_v34 = vadd.f32 %v225_v16, %v222_v29  ;;  %v244_v35 = vadd.f32 %v243_v18, %v240_v30 }
 0x107   :  { %v177_v39 = vsel %vm176_vm2, %v175_v31, %v155_v61 }
 0x108   :  { %v194_v40 = vadd.f32 %v193_v23, %v190_v32  ;;  %v212_v41 = vadd.f32 %v211_v24, %v208_v33  ;;  %v230_v42 = vadd.f32 %v229_v25, %v226_v34  ;;  %v248_v43 = vadd.f32 %v247_v26, %v244_v35 }
 0x109   :  { %v179_v45 = vsel %vm178_vm3, %v177_v39, %v173_v17 }
 0x10a   :  { %v197_v46 = vadd.f32 %v196_v36, %v194_v40  ;;  %v215_v47 = vadd.f32 %v214_v37, %v212_v41  ;;  %v233_v48 = vadd.f32 %v232_v38, %v230_v42  ;;  %267 = vst.msk [vmem:[#allocation11] sm:$0x3] %vm255_vm4, %v179_v45  ;;  %v251_v49 = vadd.f32 %v250_v44, %v248_v43 }
 0x10c   :  { %v252_v50 = vsel %vm174_vm1, %v197_v46, %v215_v47 }
 0x10d   :  { %v253_v51 = vsel %vm176_vm2, %v252_v50, %v233_v48 }
 0x10e   :  { %v254_v52 = vsel %vm178_vm3, %v253_v51, %v251_v49 }
 0x10f   :  { %v256_v53 = vsel %vm255_vm4, %v254_v52, -inf }
 0x110   :  { %257 = vmax.xlane.f32.xlu0 %v256_v53 }
 0x19d   :  { %v258_v54 = vpop.xlane.xlu0 %257 }
 0x19e   :  { %v259_v55 = vsub.f32 %v254_v52, %v258_v54 }
 0x1a0   :  { %v260_v56 = vmul.f32 1.442695, %v259_v55 }
 0x1a2   :  { %333 = vpow2.f32 %v260_v56 }
 0x1ac   :  { %v334_v57 = vpop.eup %333 }
 0x1ad   :  { %v262_v58 = vsel %vm255_vm4, %v334_v57, 0.0 }
 0x1ae   :  { %263 = vadd.xlane.f32.xlu1 %v262_v58 }
 0x1af   :  { %406 = shalt.err (!%p403_p13)
}
 0x1b0   :  { %s407_s22 = scalar_lea.hbm %s622_s5, 32 }
 0x1b1   :  { %p408_p0 = scmp.ne.s32.totalorder %s622_s5, %s407_s22  ;;  %p411_p1 = scmp.lt.u32.totalorder %s407_s22, %s622_s5 }
 0x1b3   :  { %p413_p2 = pnand %p411_p1, %p408_p0 }
 0x1b5   :  { %416 = shalt.err (!%p413_p2)
}
 0x1b6   :  { %278 = dma.vmem_to_hbm [thread:$0]  %s276_s20, 32, %s622_s5, [#allocation5]  }
 0x1b7   :  { %s455_s28 = smov [#allocation12]  }
 0x1b8   :  { %s285_s29 = sshll.u32 %s455_s28, 4  ;;  %s286_s29 = int_to_ptr.vmem [resolvable:$true] %s285_s29 }
 0x1b9   :  { %s417_s30 = scalar_lea.vmem %s286_s29, 32  ;;  %p422_p4 = scmp.lt.s32.totalorder %s286_s29, %s286_s29 }
 0x1ba   :  { %p418_p3 = scmp.ne.s32.totalorder %s286_s29, %s417_s30  ;;  %p423_p5 = scmp.lt.s32.totalorder %s417_s30, %s417_s30 }
 0x1bc   :  { %p424_p6 = por %p423_p5, %p422_p4 }
 0x1be   :  { %p425_p7 = pnand %p424_p6, %p418_p3 }
 0x23b   :  { %v264_v59 = vpop.xlane.xlu1 %263 }
 0x23c   :  { %335 = vrcp.f32 %v264_v59 }
 0x246   :  { %v336_v60 = vpop.eup %335 }
 0x247   :  { %v266_v61 = vmul.f32 %v336_v60, %v334_v57 }
 0x249   :  { %268 = vst.msk [vmem:[#allocation12] sm:$0x3] %vm255_vm4, %v266_v61 }
 0x24a   :  { %428 = shalt.err (!%p425_p7)
}
 0x24b   :  { %s429_s5 = scalar_lea.hbm %s623_s6, 32 }
 0x24c   :  { %p430_p8 = scmp.ne.s32.totalorder %s623_s6, %s429_s5  ;;  %p433_p9 = scmp.lt.u32.totalorder %s429_s5, %s623_s6 }
 0x24e   :  { %p435_p10 = pnand %p433_p9, %p430_p8 }
 0x250   :  { %438 = shalt.err (!%p435_p10)
}
 0x251   :  { %288 = dma.vmem_to_hbm [thread:$0]  %s286_s29, 32, %s623_s6, [#allocation13]  }
 0x252   :  { %445 = dma.done.wait [#allocation5], 32  }
 0x253   :  { %446 = vsyncadd [#allocation5], 4294967264 }
 0x254   :  { %447 = dma.done.wait [#allocation13], 32  }
 0x255   :  { %448 = vsyncadd [#allocation13], 4294967264 }
 0x256   :  { %295 = vsyncpa [#allocation4], 1 }
 0x257   :  { %296 = vsyncpa [#allocation5], 1 }
 0x258   :  { %297 = vsyncpa [#allocation13], 1 }
 0x259   :  { %298 = vsyncpa [#allocation6], 1 }
 0x25a   :  { %299 = vsyncpa [#allocation9], 1 }

</bundles_post_ra>
